<compile_context>
chip_gen: v6e
topology: v6e:2x2x1
jax: 0.10.0
libtpu: 0.0.40
codegen_flags: <defaults>
</compile_context>

<pallas_src>
import jax
import jax.numpy as jnp
from jax.experimental import pallas as pl
from jax.experimental.pallas import tpu as pltpu


def _round_up(x, m):
    return ((x + m - 1) // m) * m


def _cdiv(a, b):
    return (a + b - 1) // b


def mlp_kernel(x_ref, w1_ref, b1_ref, w2_ref, b2_ref, w3_ref, b3_ref,
               y_ref, h2_ref):
    cdt = w1_ref.dtype                       # MXU operand dtype (bf16); accum is f32.
    x = x_ref[...].astype(cdt)               # f32 -> bf16 in-kernel (no extra HBM pass)
    # h_1 = relu(x @ W1 + b1)
    h1 = jnp.dot(x, w1_ref[...], preferred_element_type=jnp.float32)
    h1 = jnp.maximum(h1 + b1_ref[...], 0.0)
    # h_2 = relu(h1 @ W2 + b2)
    h2 = jnp.dot(h1.astype(cdt), w2_ref[...], preferred_element_type=jnp.float32)
    h2 = jnp.maximum(h2 + b2_ref[...], 0.0)
    # y_pred = h2 @ W3 + b3 (no activation)
    y = jnp.dot(h2.astype(cdt), w3_ref[...], preferred_element_type=jnp.float32)
    y = y + b3_ref[...]
    h2_ref[...] = h2.astype(h2_ref.dtype)    # bf16, lane-dense 128-wide store
    y_ref[...] = y.astype(y_ref.dtype)       # bf16, lane-dense 128-wide store


def prepare_params(params, input_dim, compute_dtype=jnp.bfloat16):
    """One-time layout prep: (out,in)->(in,out) transpose, zero-pad to 128-lane
    multiples, cast weights to the MXU compute dtype. Done once, outside the step."""
    w1, b1, w2, b2, w3, b3 = params
    dims = {
        "d_in": input_dim, "h1": w1.shape[0], "h2": w2.shape[0], "out": w3.shape[0],
        "d_in_p": _round_up(input_dim, 128),
        "h1_p": _round_up(w1.shape[0], 128),   # 250 -> 256
        "h2_p": _round_up(w2.shape[0], 128),   # 100 -> 128
        "out_p": _round_up(w3.shape[0], 128),  # 10  -> 128
    }

    def prep(w, b, k_pad, n_pad):
        n, k = w.shape  # torch layout (out_features, in_features)
        wt = jnp.zeros((k_pad, n_pad), compute_dtype)
        wt = wt.at[:k, :n].set(w.T.astype(compute_dtype))
        br = jnp.zeros((1, n_pad), jnp.float32)
        br = br.at[0, :n].set(b.astype(jnp.float32))
        return wt, br

    w1p, b1p = prep(w1, b1, dims["d_in_p"], dims["h1_p"])
    w2p, b2p = prep(w2, b2, dims["h1_p"], dims["h2_p"])
    w3p, b3p = prep(w3, b3, dims["h2_p"], dims["out_p"])
    return (w1p, b1p, w2p, b2p, w3p, b3p), dims


def _choose_tiling(batch, block_b):
    """Pick (TB, padded_batch). TB rounded to 16 (bf16 sublane packing); large batches
    get an EVEN grid with >= 4 steps (overlap + v7x megacore); tiny batches -> 1 tile."""
    if batch <= 4 * 16:
        tb = _round_up(batch, 16)
        return tb, tb
    steps = max(4, _cdiv(batch, block_b))
    if steps % 2:
        steps += 1
    tb = _round_up(_cdiv(batch, steps), 16)
    steps = _cdiv(batch, tb)
    if steps % 2:
        steps += 1
    return tb, tb * steps


def mlp_forward(x_nchw, prepared_params, dims, *, block_b=1024, trim=True):
    """Pallas forward. trim=True returns (y_pred[B,out], h_2[B,100]) like the torch
    module; trim=False returns the lane/batch-padded bf16 arrays so a downstream
    consumer can fuse the slice instead of paying an extra HBM pass."""
    w1p, b1p, w2p, b2p, w3p, b3p = prepared_params
    batch = x_nchw.shape[0]
    d_in, d_in_p = dims["d_in"], dims["d_in_p"]
    h1_p, h2_p, out_p = dims["h1_p"], dims["h2_p"], dims["out_p"]

    # Flatten like torch x.view(batch, -1); keep f32 — cast happens inside the kernel.
    x = x_nchw.reshape(batch, -1)
    assert x.shape[1] == d_in

    tb, b_pad = _choose_tiling(batch, block_b)
    pad_rows, pad_cols = b_pad - batch, d_in_p - d_in
    if pad_rows or pad_cols:
        x = jnp.pad(x, ((0, pad_rows), (0, pad_cols)))

    grid = (b_pad // tb,)
    batched = lambda i: (i, 0)     # x / y / h2 stream per batch tile
    resident = lambda i: (0, 0)    # weights & biases stay VMEM-resident

    flops = 2 * b_pad * (d_in_p * h1_p + h1_p * h2_p + h2_p * out_p)
    bytes_accessed = (
        int(x.size) * x.dtype.itemsize
        + sum(int(a.size) * a.dtype.itemsize for a in prepared_params)
        + b_pad * (out_p + h2_p) * 2)  # bf16 outputs

    y_full, h2_full = pl.pallas_call(
        mlp_kernel,
        out_shape=(
            jax.ShapeDtypeStruct((b_pad, out_p), jnp.bfloat16),
            jax.ShapeDtypeStruct((b_pad, h2_p), jnp.bfloat16),
        ),
        grid=grid,
        in_specs=[
            pl.BlockSpec((tb, d_in_p), batched),
            pl.BlockSpec((d_in_p, h1_p), resident),
            pl.BlockSpec((1, h1_p), resident),
            pl.BlockSpec((h1_p, h2_p), resident),
            pl.BlockSpec((1, h2_p), resident),
            pl.BlockSpec((h2_p, out_p), resident),
            pl.BlockSpec((1, out_p), resident),
        ],
        out_specs=(
            pl.BlockSpec((tb, out_p), batched),
            pl.BlockSpec((tb, h2_p), batched),
        ),
        compiler_params=pltpu.CompilerParams(
            dimension_semantics=("parallel",),
            vmem_limit_bytes=48 * 1024 * 1024,   # fits v7x's 64 MiB, ample on v5e/v6e
        ),
        cost_estimate=pl.CostEstimate(
            flops=flops, transcendentals=0, bytes_accessed=bytes_accessed),
    )(x, w1p, b1p, w2p, b2p, w3p, b3p)

    if not trim:
        return y_full, h2_full
    return y_full[:batch, :dims["out"]], h2_full[:batch, :dims["h2"]]


def init_params(key, input_dim, output_dim):
    """Deterministic init matching the nn.Linear shapes in MLP.__init__ (torch layout)."""
    h1, h2 = 250, 100
    k = jax.random.split(key, 6)

    def lin(kw, kb, fan_in, fan_out):
        bound = 1.0 / jnp.sqrt(fan_in)
        w = jax.random.uniform(kw, (fan_out, fan_in), jnp.float32, -bound, bound)
        b = jax.random.uniform(kb, (fan_out,), jnp.float32, -bound, bound)
        return w, b

    w1, b1 = lin(k[0], k[1], input_dim, h1)
    w2, b2 = lin(k[2], k[3], h1, h2)
    w3, b3 = lin(k[4], k[5], h2, output_dim)
    return (w1, b1, w2, b2, w3, b3)


def reference_forward_f32(x_nchw, params):
    """Pure-JAX f32 reference replicating the torch forward."""
    w1, b1, w2, b2, w3, b3 = params
    x = x_nchw.reshape(x_nchw.shape[0], -1).astype(jnp.float32)
    h1 = jnp.maximum(x @ w1.T + b1, 0.0)
    h2 = jnp.maximum(h1 @ w2.T + b2, 0.0)
    return h2 @ w3.T + b3, h2


def reference_forward_bf16(x_nchw, params):
    """Pure-JAX reference emulating kernel precision: bf16 operands, f32 accum."""
    w1, b1, w2, b2, w3, b3 = params
    bf = jnp.bfloat16
    dot = lambda a, b: jnp.dot(a.astype(bf), b.astype(bf),
                               preferred_element_type=jnp.float32)
    x = x_nchw.reshape(x_nchw.shape[0], -1)
    h1 = jnp.maximum(dot(x, w1.T) + b1, 0.0)
    h2 = jnp.maximum(dot(h1, w2.T) + b2, 0.0)
    return dot(h2, w3.T) + b3, h2


if __name__ == "__main__":
    key = jax.random.PRNGKey(0)
    kx, kp = jax.random.split(key)

    # Small NCHW input consistent with color-MNIST-style images: [B=2, C=4, H=16, W=16]
    B, C, H, W = 2, 4, 16, 16
    input_dim = C * H * W          # 1024 after flatten (already a multiple of 128)
    output_dim = 10

    x = jax.random.normal(kx, (B, C, H, W), jnp.float32)
    params = init_params(kp, input_dim, output_dim)

    prepared, dims = prepare_params(params, input_dim)
    fwd = jax.jit(lambda xx: mlp_forward(xx, prepared, dims))
    y_pred, h_2 = jax.block_until_ready(fwd(x))

    assert y_pred.shape == (B, output_dim) and h_2.shape == (B, 100)

    y_f = y_pred.astype(jnp.float32)
    h_f = h_2.astype(jnp.float32)

    # Check against a reference with the same bf16-operand / f32-accum precision
    # (outputs are now stored in bf16, hence the slightly looser tolerance).
    y_ref_bf, h2_ref_bf = reference_forward_bf16(x, params)
    assert jnp.allclose(y_f, y_ref_bf, atol=2.5e-2, rtol=2.5e-2)
    assert jnp.allclose(h_f, h2_ref_bf, atol=2.5e-2, rtol=2.5e-2)

    # Loose sanity check against the full-f32 torch-equivalent reference.
    y_ref32, h2_ref32 = reference_forward_f32(x, params)
    assert jnp.allclose(y_f, y_ref32, atol=7.5e-2, rtol=7.5e-2)
    assert jnp.allclose(h_f, h2_ref32, atol=7.5e-2, rtol=7.5e-2)

    print("KERNEL_OK")
</pallas_src>

<mosaic_0001>
module attributes {stable_mosaic.version = 11 : i64} {
  func.func @mlp_kernel(%arg0: i32, %arg1: memref<16x1024xf32, #tpu.memory_space<vmem>>, %arg2: memref<1024x256xbf16, #tpu.memory_space<vmem>>, %arg3: memref<1x256xf32, #tpu.memory_space<vmem>>, %arg4: memref<256x128xbf16, #tpu.memory_space<vmem>>, %arg5: memref<1x128xf32, #tpu.memory_space<vmem>>, %arg6: memref<128x128xbf16, #tpu.memory_space<vmem>>, %arg7: memref<1x128xf32, #tpu.memory_space<vmem>>, %arg8: memref<16x128xbf16, #tpu.memory_space<vmem>>, %arg9: memref<16x128xbf16, #tpu.memory_space<vmem>>) attributes {dimension_semantics = [#tpu.dimension_semantics<parallel>], iteration_bounds = array<i64: 1>, scalar_prefetch = 0 : i64, scratch_operands = 0 : i64, tpu.core_type = #tpu.core_type<tc>, window_params = [{transform_indices = @transform_0, window_bounds = array<i64: 16, 1024>}, {pipeline_mode = #tpu.pipeline_mode<synchronous>, transform_indices = @transform_1, window_bounds = array<i64: 1024, 256>}, {pipeline_mode = #tpu.pipeline_mode<synchronous>, transform_indices = @transform_2, window_bounds = array<i64: 1, 256>}, {pipeline_mode = #tpu.pipeline_mode<synchronous>, transform_indices = @transform_3, window_bounds = array<i64: 256, 128>}, {pipeline_mode = #tpu.pipeline_mode<synchronous>, transform_indices = @transform_4, window_bounds = array<i64: 1, 128>}, {pipeline_mode = #tpu.pipeline_mode<synchronous>, transform_indices = @transform_5, window_bounds = array<i64: 128, 128>}, {pipeline_mode = #tpu.pipeline_mode<synchronous>, transform_indices = @transform_6, window_bounds = array<i64: 1, 128>}, {transform_indices = @transform_7, window_bounds = array<i64: 16, 128>}, {transform_indices = @transform_8, window_bounds = array<i64: 16, 128>}]} {
    %c0 = arith.constant 0 : index
    %c0_0 = arith.constant 0 : index
    %0 = vector.load %arg1[%c0, %c0_0] : memref<16x1024xf32, #tpu.memory_space<vmem>>, vector<16x1024xf32>
    %1 = arith.truncf %0 : vector<16x1024xf32> to vector<16x1024xbf16>
    %c0_1 = arith.constant 0 : index
    %c0_2 = arith.constant 0 : index
    %2 = vector.load %arg2[%c0_1, %c0_2] : memref<1024x256xbf16, #tpu.memory_space<vmem>>, vector<1024x256xbf16>
    %cst = arith.constant dense<0.000000e+00> : vector<16x256xf32>
    %3 = tpu.matmul %1, %2, %cst {dimension_numbers = #tpu.dot_dimension_numbers<[1], [0], [0], [1], [0, 0, 1, 1], [], []>} : vector<16x1024xbf16>, vector<1024x256xbf16>, vector<16x256xf32> -> vector<16x256xf32>
    %c0_3 = arith.constant 0 : index
    %c0_4 = arith.constant 0 : index
    %4 = vector.load %arg3[%c0_3, %c0_4] : memref<1x256xf32, #tpu.memory_space<vmem>>, vector<1x256xf32>
    %5 = vector.broadcast %4 : vector<1x256xf32> to vector<16x256xf32>
    %6 = arith.addf %3, %5 : vector<16x256xf32>
    %cst_5 = arith.constant 0.000000e+00 : f32
    %7 = vector.broadcast %cst_5 : f32 to vector<16x256xf32>
    %8 = arith.maximumf %6, %7 : vector<16x256xf32>
    %9 = arith.truncf %8 : vector<16x256xf32> to vector<16x256xbf16>
    %c0_6 = arith.constant 0 : index
    %c0_7 = arith.constant 0 : index
    %10 = vector.load %arg4[%c0_6, %c0_7] : memref<256x128xbf16, #tpu.memory_space<vmem>>, vector<256x128xbf16>
    %cst_8 = arith.constant dense<0.000000e+00> : vector<16x128xf32>
    %11 = tpu.matmul %9, %10, %cst_8 {dimension_numbers = #tpu.dot_dimension_numbers<[1], [0], [0], [1], [0, 0, 1, 1], [], []>} : vector<16x256xbf16>, vector<256x128xbf16>, vector<16x128xf32> -> vector<16x128xf32>
    %c0_9 = arith.constant 0 : index
    %c0_10 = arith.constant 0 : index
    %12 = vector.load %arg5[%c0_9, %c0_10] : memref<1x128xf32, #tpu.memory_space<vmem>>, vector<1x128xf32>
    %13 = vector.broadcast %12 : vector<1x128xf32> to vector<16x128xf32>
    %14 = arith.addf %11, %13 : vector<16x128xf32>
    %cst_11 = arith.constant 0.000000e+00 : f32
    %15 = vector.broadcast %cst_11 : f32 to vector<16x128xf32>
    %16 = arith.maximumf %14, %15 : vector<16x128xf32>
    %17 = arith.truncf %16 : vector<16x128xf32> to vector<16x128xbf16>
    %c0_12 = arith.constant 0 : index
    %c0_13 = arith.constant 0 : index
    %18 = vector.load %arg6[%c0_12, %c0_13] : memref<128x128xbf16, #tpu.memory_space<vmem>>, vector<128x128xbf16>
    %cst_14 = arith.constant dense<0.000000e+00> : vector<16x128xf32>
    %19 = tpu.matmul %17, %18, %cst_14 {dimension_numbers = #tpu.dot_dimension_numbers<[1], [0], [0], [1], [0, 0, 1, 1], [], []>} : vector<16x128xbf16>, vector<128x128xbf16>, vector<16x128xf32> -> vector<16x128xf32>
    %c0_15 = arith.constant 0 : index
    %c0_16 = arith.constant 0 : index
    %20 = vector.load %arg7[%c0_15, %c0_16] : memref<1x128xf32, #tpu.memory_space<vmem>>, vector<1x128xf32>
    %21 = vector.broadcast %20 : vector<1x128xf32> to vector<16x128xf32>
    %22 = arith.addf %19, %21 : vector<16x128xf32>
    %23 = arith.truncf %16 : vector<16x128xf32> to vector<16x128xbf16>
    %c0_17 = arith.constant 0 : index
    %c0_18 = arith.constant 0 : index
    %24 = vector.load %arg9[%c0_17, %c0_18] : memref<16x128xbf16, #tpu.memory_space<vmem>>, vector<16x128xbf16>
    tpu.vector_store %arg9[%c0_17, %c0_18], %23 {strides = array<i32>} : memref<16x128xbf16, #tpu.memory_space<vmem>>, vector<16x128xbf16>,
    %25 = arith.truncf %22 : vector<16x128xf32> to vector<16x128xbf16>
    %c0_19 = arith.constant 0 : index
    %c0_20 = arith.constant 0 : index
    %26 = vector.load %arg8[%c0_19, %c0_20] : memref<16x128xbf16, #tpu.memory_space<vmem>>, vector<16x128xbf16>
    tpu.vector_store %arg8[%c0_19, %c0_20], %25 {strides = array<i32>} : memref<16x128xbf16, #tpu.memory_space<vmem>>, vector<16x128xbf16>,
    return
  }
  func.func @transform_0(%arg0: i32) -> (i32, i32) {
    %c0_i32 = arith.constant 0 : i32
    %c0_i32_0 = arith.constant 0 : i32
    return %arg0, %c0_i32 : i32, i32
  }
  func.func @transform_1(%arg0: i32) -> (i32, i32) {
    %c0_i32 = arith.constant 0 : i32
    %c0_i32_0 = arith.constant 0 : i32
    %c0_i32_1 = arith.constant 0 : i32
    return %c0_i32, %c0_i32_0 : i32, i32
  }
  func.func @transform_2(%arg0: i32) -> (i32, i32) {
    %c0_i32 = arith.constant 0 : i32
    %c0_i32_0 = arith.constant 0 : i32
    %c0_i32_1 = arith.constant 0 : i32
    return %c0_i32, %c0_i32_0 : i32, i32
  }
  func.func @transform_3(%arg0: i32) -> (i32, i32) {
    %c0_i32 = arith.constant 0 : i32
    %c0_i32_0 = arith.constant 0 : i32
    %c0_i32_1 = arith.constant 0 : i32
    return %c0_i32, %c0_i32_0 : i32, i32
  }
  func.func @transform_4(%arg0: i32) -> (i32, i32) {
    %c0_i32 = arith.constant 0 : i32
    %c0_i32_0 = arith.constant 0 : i32
    %c0_i32_1 = arith.constant 0 : i32
    return %c0_i32, %c0_i32_0 : i32, i32
  }
  func.func @transform_5(%arg0: i32) -> (i32, i32) {
    %c0_i32 = arith.constant 0 : i32
    %c0_i32_0 = arith.constant 0 : i32
    %c0_i32_1 = arith.constant 0 : i32
    return %c0_i32, %c0_i32_0 : i32, i32
  }
  func.func @transform_6(%arg0: i32) -> (i32, i32) {
    %c0_i32 = arith.constant 0 : i32
    %c0_i32_0 = arith.constant 0 : i32
    %c0_i32_1 = arith.constant 0 : i32
    return %c0_i32, %c0_i32_0 : i32, i32
  }
  func.func @transform_7(%arg0: i32) -> (i32, i32) {
    %c0_i32 = arith.constant 0 : i32
    %c0_i32_0 = arith.constant 0 : i32
    return %arg0, %c0_i32 : i32, i32
  }
  func.func @transform_8(%arg0: i32) -> (i32, i32) {
    %c0_i32 = arith.constant 0 : i32
    %c0_i32_0 = arith.constant 0 : i32
    return %arg0, %c0_i32 : i32, i32
  }
}

</mosaic_0001>

<bundles_post_ra>
// kernel: _lambda_.1
= control target key start
LH: loop header
LB: loop body
LE: loop exit
PB: predicated region body
PF: predicated region fallthrough
CT: control target
= control target key end

     0   :  { %14 = vsyncpa [#allocation3], 0  ;;  %s1810_s27 = smov [#allocation2]   ;;  %s2007_s0 = inlined_call_operand.vmem [shape: f32[16,1024], index: 0, kind: input, shape index: {}]   ;;  %s2008_s1 = inlined_call_operand.hbm [shape: bf16[1024,256], index: 1, kind: input, shape index: {}]   ;;  %s2009_s2 = inlined_call_operand.vmem [shape: f32[1,256], index: 2, kind: input, shape index: {}]   ;;  %s2010_s3 = inlined_call_operand.vmem [shape: bf16[256,128], index: 3, kind: input, shape index: {}]   ;;  %s2011_s4 = inlined_call_operand.vmem [shape: f32[1,128], index: 4, kind: input, shape index: {}]   ;;  %s2012_s5 = inlined_call_operand.vmem [shape: bf16[128,128], index: 5, kind: input, shape index: {}]   ;;  %s2013_s6 = inlined_call_operand.vmem [shape: f32[1,128], index: 6, kind: input, shape index: {}]   ;;  %s2014_s7 = inlined_call_operand.vmem [shape: bf16[16,128], index: 7, kind: output, shape index: {0}]   ;;  %s2015_s8 = inlined_call_operand.vmem [shape: bf16[16,128], index: 8, kind: output, shape index: {1}]  }
   0x1   :  { %s22_s28 = sshll.u32 %s1810_s27, 4  ;;  %s23_s28 = int_to_ptr.vmem [resolvable:$true] %s22_s28 }
   0x2   :  { %s1796_s29 = scalar_lea.vmem %s23_s28, 16384  ;;  %p1801_p1 = scmp.lt.s32.totalorder %s23_s28, %s23_s28 }
   0x3   :  { %p1797_p0 = scmp.ne.s32.totalorder %s23_s28, %s1796_s29  ;;  %p1802_p2 = scmp.lt.s32.totalorder %s1796_s29, %s1796_s29 }
   0x5   :  { %p1803_p3 = por %p1802_p2, %p1801_p1 }
   0x7   :  { %p1804_p4 = pnand %p1803_p3, %p1797_p0 }
   0x9   :  { %1807 = shalt.err (!%p1804_p4)
}
   0xa   :  { %s1811_s30 = smov 128   ;;  %s1812_s9 = smov 8  }
   0xb   :  { %28 = dma.hbm_to_vmem [thread:$0]  %s2008_s1, 16384, %s23_s28, [#allocation3], %s1811_s30, %s1811_s30, %s1812_s9  }
   0xc   :  { %1808 = dma.done.wait [#allocation3], 16384  }
   0xd   :  { %1809 = vsyncadd [#allocation3], 4294950912  ;;  %v1572_v0 = vld [vmem:[#allocation2 + $0x74] ss:$8 sps:$4 sm:$0xff]   ;;  %v1576_v2 = vld [vmem:[#allocation2 + $0x70] ss:$8 sps:$4 sm:$0xff]  }
   0xe   :  { %v1574_v1 = vld [vmem:[#allocation2 + $0x174] ss:$8 sps:$4 sm:$0xff]   ;;  %847 = vmatprep.subr.bf16.mxu0 %v1572_v0  ;;  %v1577_v3 = vld [vmem:[#allocation2 + $0x170] ss:$8 sps:$4 sm:$0xff]   ;;  %v1578_v4 = vld [vmem:[#allocation2 + $0x64] ss:$8 sps:$4 sm:$0xff]  }
   0xf   :  { %890 = vmatprep.subr.bf16.mxu1 %v1574_v1  ;;  %848 = vmatpush1.bf16.msra.mxu0 %v1576_v2  ;;  %v1580_v5 = vld [vmem:[#allocation2 + $0x164] ss:$8 sps:$4 sm:$0xff]   ;;  %v1582_v6 = vld [vmem:[#allocation2 + $0x60] ss:$8 sps:$4 sm:$0xff]   ;;  %v1584_v8 = vld [vmem:[#allocation2 + $0x54] ss:$8 sps:$4 sm:$0xff]  }
  0x10   :  { %891 = vmatpush1.bf16.msra.mxu1 %v1577_v3  ;;  %849 = vmatprep.subr.bf16.mxu0 %v1578_v4  ;;  %v1583_v7 = vld [vmem:[#allocation2 + $0x160] ss:$8 sps:$4 sm:$0xff]   ;;  %v1586_v9 = vld [vmem:[#allocation2 + $0x154] ss:$8 sps:$4 sm:$0xff]   ;;  %v1588_v10 = vld [vmem:[#allocation2 + $0x50] ss:$8 sps:$4 sm:$0xff]  }
  0x11   :  { %892 = vmatprep.subr.bf16.mxu1 %v1580_v5  ;;  %v1589_v11 = vld [vmem:[#allocation2 + $0x150] ss:$8 sps:$4 sm:$0xff]   ;;  %v1590_v12 = vld [vmem:[#allocation2 + $0x44] ss:$8 sps:$4 sm:$0xff]   ;;  %v1594_v14 = vld [vmem:[#allocation2 + $0x40] ss:$8 sps:$4 sm:$0xff]  }
  0x12   :  { %v1592_v13 = vld [vmem:[#allocation2 + $0x144] ss:$8 sps:$4 sm:$0xff]   ;;  %v1595_v15 = vld [vmem:[#allocation2 + $0x140] ss:$8 sps:$4 sm:$0xff]   ;;  %v1596_v16 = vld [vmem:[#allocation2 + $0x34] ss:$8 sps:$4 sm:$0xff]  }
  0x13   :  { %850 = vmatpush1.bf16.msra.mxu0 %v1582_v6  ;;  %v1598_v17 = vld [vmem:[#allocation2 + $0x134] ss:$8 sps:$4 sm:$0xff]   ;;  %v1600_v18 = vld [vmem:[#allocation2 + $0x30] ss:$8 sps:$4 sm:$0xff]   ;;  %v1602_v20 = vld [vmem:[#allocation2 + $0x24] ss:$8 sps:$4 sm:$0xff]  }
  0x14   :  { %893 = vmatpush1.bf16.msra.mxu1 %v1583_v7  ;;  %851 = vmatprep.subr.bf16.mxu0 %v1584_v8  ;;  %v1601_v19 = vld [vmem:[#allocation2 + $0x130] ss:$8 sps:$4 sm:$0xff]   ;;  %v1604_v21 = vld [vmem:[#allocation2 + $0x124] ss:$8 sps:$4 sm:$0xff]   ;;  %v1606_v22 = vld [vmem:[#allocation2 + $0x20] ss:$8 sps:$4 sm:$0xff]  }
  0x15   :  { %894 = vmatprep.subr.bf16.mxu1 %v1586_v9  ;;  %v1607_v23 = vld [vmem:[#allocation2 + $0x120] ss:$8 sps:$4 sm:$0xff]   ;;  %v1608_v24 = vld [vmem:[#allocation2 + $0x14] ss:$8 sps:$4 sm:$0xff]   ;;  %v1612_v26 = vld [vmem:[#allocation2 + $0x10] ss:$8 sps:$4 sm:$0xff]  }
  0x16   :  { %v1610_v25 = vld [vmem:[#allocation2 + $0x114] ss:$8 sps:$4 sm:$0xff]   ;;  %v1613_v27 = vld [vmem:[#allocation2 + $0x110] ss:$8 sps:$4 sm:$0xff]   ;;  %v1614_v28 = vld [vmem:[#allocation2 + $0x4] ss:$8 sps:$4 sm:$0xff]  }
  0x17   :  { %852 = vmatpush1.bf16.msra.mxu0 %v1588_v10  ;;  %v1616_v29 = vld [vmem:[#allocation2 + $0x104] ss:$8 sps:$4 sm:$0xff]   ;;  %v1618_v30 = vld [vmem:[#allocation2] ss:$8 sps:$4 sm:$0xff]   ;;  %v1620_v32 = vld [vmem:[#allocation2 + $0xf4] ss:$8 sps:$4 sm:$0xff]  }
  0x18   :  { %895 = vmatpush1.bf16.msra.mxu1 %v1589_v11  ;;  %853 = vmatprep.subr.bf16.mxu0 %v1590_v12  ;;  %v1619_v31 = vld [vmem:[#allocation2 + $0x100] ss:$8 sps:$4 sm:$0xff]   ;;  %v1622_v33 = vld [vmem:[#allocation2 + $0x1f4] ss:$8 sps:$4 sm:$0xff]   ;;  %v1624_v34 = vld [vmem:[#allocation2 + $0xf0] ss:$8 sps:$4 sm:$0xff]  }
  0x19   :  { %896 = vmatprep.subr.bf16.mxu1 %v1592_v13  ;;  %v1625_v35 = vld [vmem:[#allocation2 + $0x1f0] ss:$8 sps:$4 sm:$0xff]   ;;  %v1626_v36 = vld [vmem:[#allocation2 + $0xe4] ss:$8 sps:$4 sm:$0xff]   ;;  %v1630_v38 = vld [vmem:[#allocation2 + $0xe0] ss:$8 sps:$4 sm:$0xff]  }
  0x1a   :  { %v1628_v37 = vld [vmem:[#allocation2 + $0x1e4] ss:$8 sps:$4 sm:$0xff]   ;;  %v1631_v39 = vld [vmem:[#allocation2 + $0x1e0] ss:$8 sps:$4 sm:$0xff]   ;;  %v1632_v40 = vld [vmem:[#allocation2 + $0xd4] ss:$8 sps:$4 sm:$0xff]  }
  0x1b   :  { %854 = vmatpush1.bf16.msra.mxu0 %v1594_v14  ;;  %v1634_v41 = vld [vmem:[#allocation2 + $0x1d4] ss:$8 sps:$4 sm:$0xff]   ;;  %v1636_v42 = vld [vmem:[#allocation2 + $0xd0] ss:$8 sps:$4 sm:$0xff]   ;;  %v1638_v44 = vld [vmem:[#allocation2 + $0xc4] ss:$8 sps:$4 sm:$0xff]  }
  0x1c   :  { %897 = vmatpush1.bf16.msra.mxu1 %v1595_v15  ;;  %855 = vmatprep.subr.bf16.mxu0 %v1596_v16  ;;  %v1637_v43 = vld [vmem:[#allocation2 + $0x1d0] ss:$8 sps:$4 sm:$0xff]   ;;  %v1640_v45 = vld [vmem:[#allocation2 + $0x1c4] ss:$8 sps:$4 sm:$0xff]   ;;  %v1642_v50 = vld [vmem:[#allocation2 + $0xc0] ss:$8 sps:$4 sm:$0xff]  }
  0x1d   :  { %898 = vmatprep.subr.bf16.mxu1 %v1598_v17  ;;  %v44_v46 = vld [vmem:[%s2007_s0 + $0x8] sm:$0xff]  ;;  %v46_v48 = vld [vmem:[%s2007_s0 + $0x18] sm:$0xff]  ;;  %v43_v6 = vld [vmem:[%s2007_s0] sm:$0xff]  ;;  %vm1814_vm0 = vmmov 0  }
  0x1e   :  { %v52_v47 = vld [vmem:[%s2007_s0 + $0x48] sm:$0xff]  ;;  %v54_v49 = vld [vmem:[%s2007_s0 + $0x58] sm:$0xff]  ;;  %v51_v7 = vld [vmem:[%s2007_s0 + $0x40] sm:$0xff] }
  0x1f   :  { %856 = vmatpush1.bf16.msra.mxu0 %v1600_v18  ;;  %v1643_v51 = vld [vmem:[#allocation2 + $0x1c0] ss:$8 sps:$4 sm:$0xff]   ;;  %v1644_v52 = vld [vmem:[#allocation2 + $0xb4] ss:$8 sps:$4 sm:$0xff]   ;;  %v60_v53 = vpack.c.bf16 %v52_v47, %v44_v46  ;;  %v62_v54 = vpack.c.bf16 %v54_v49, %v46_v48  ;;  %v1648_v56 = vld [vmem:[#allocation2 + $0xb0] ss:$8 sps:$4 sm:$0xff]   ;;  %v59_v12 = vpack.c.bf16 %v51_v7, %v43_v6 }
  0x20   :  { %899 = vmatpush1.bf16.msra.mxu1 %v1601_v19  ;;  %857 = vmatprep.subr.bf16.mxu0 %v1602_v20  ;;  %v1646_v55 = vld [vmem:[#allocation2 + $0x1b4] ss:$8 sps:$4 sm:$0xff]   ;;  %v1649_v57 = vld [vmem:[#allocation2 + $0x1b0] ss:$8 sps:$4 sm:$0xff]   ;;  %v1650_v58 = vld [vmem:[#allocation2 + $0xa4] ss:$8 sps:$4 sm:$0xff]  }
  0x21   :  { %900 = vmatprep.subr.bf16.mxu1 %v1604_v21  ;;  %879 = vmatprep.mubr.bf16.mxu0 %v60_v53  ;;  %v1652_v59 = vld [vmem:[#allocation2 + $0x1a4] ss:$8 sps:$4 sm:$0xff]   ;;  %v1654_v60 = vld [vmem:[#allocation2 + $0xa0] ss:$8 sps:$4 sm:$0xff]   ;;  %v1656_v62 = vld [vmem:[#allocation2 + $0x94] ss:$8 sps:$4 sm:$0xff]  }
  0x22   :  { %922 = vmatprep.mubr.bf16.mxu1 %v62_v54  ;;  %v1655_v61 = vld [vmem:[#allocation2 + $0x1a0] ss:$8 sps:$4 sm:$0xff]   ;;  %v1658_v63 = vld [vmem:[#allocation2 + $0x194] ss:$8 sps:$4 sm:$0xff]   ;;  %v1660_v0 = vld [vmem:[#allocation2 + $0x90] ss:$8 sps:$4 sm:$0xff]  }
  0x23   :  { %858 = vmatpush1.bf16.msra.mxu0 %v1606_v22  ;;  %v1661_v1 = vld [vmem:[#allocation2 + $0x190] ss:$8 sps:$4 sm:$0xff]   ;;  %v1662_v2 = vld [vmem:[#allocation2 + $0x84] ss:$8 sps:$4 sm:$0xff]   ;;  %v1666_v4 = vld [vmem:[#allocation2 + $0x80] ss:$8 sps:$4 sm:$0xff]  }
  0x24   :  { %901 = vmatpush1.bf16.msra.mxu1 %v1607_v23  ;;  %859 = vmatprep.subr.bf16.mxu0 %v1608_v24  ;;  %v1664_v3 = vld [vmem:[#allocation2 + $0x184] ss:$8 sps:$4 sm:$0xff]   ;;  %v1667_v5 = vld [vmem:[#allocation2 + $0x180] ss:$8 sps:$4 sm:$0xff]   ;;  %v45_v8 = vld [vmem:[%s2007_s0 + $0x10] sm:$0xff] }
  0x25   :  { %902 = vmatprep.subr.bf16.mxu1 %v1610_v25  ;;  %v53_v9 = vld [vmem:[%s2007_s0 + $0x50] sm:$0xff]  ;;  %v1676_v16 = vld [vmem:[#allocation2 + $0x264] ss:$8 sps:$4 sm:$0xff]   ;;  %v1674_v18 = vld [vmem:[#allocation2 + $0x260] ss:$8 sps:$4 sm:$0xff]  }
  0x26   :  { %v1670_v10 = vld [vmem:[#allocation2 + $0x274] ss:$8 sps:$4 sm:$0xff]   ;;  %v61_v13 = vpack.c.bf16 %v53_v9, %v45_v8  ;;  %v1668_v14 = vld [vmem:[#allocation2 + $0x270] ss:$8 sps:$4 sm:$0xff]   ;;  %v1679_v17 = vld [vmem:[#allocation2 + $0x364] ss:$8 sps:$4 sm:$0xff]  }
  0x27   :  { %860 = vmatpush1.bf16.msra.mxu0 %v1612_v26  ;;  %v1673_v11 = vld [vmem:[#allocation2 + $0x374] ss:$8 sps:$4 sm:$0xff]   ;;  %v1671_v15 = vld [vmem:[#allocation2 + $0x370] ss:$8 sps:$4 sm:$0xff]   ;;  %v1677_v19 = vld [vmem:[#allocation2 + $0x360] ss:$8 sps:$4 sm:$0xff]  }
  0x28   :  { %903 = vmatpush1.bf16.msra.mxu1 %v1613_v27  ;;  %861 = vmatprep.subr.bf16.mxu0 %v1614_v28  ;;  %v1682_v20 = vld [vmem:[#allocation2 + $0x254] ss:$8 sps:$4 sm:$0xff]   ;;  %v1680_v22 = vld [vmem:[#allocation2 + $0x250] ss:$8 sps:$4 sm:$0xff]   ;;  %v1688_v24 = vld [vmem:[#allocation2 + $0x244] ss:$8 sps:$4 sm:$0xff]  }
  0x29   :  { %904 = vmatprep.subr.bf16.mxu1 %v1616_v29  ;;  %v1685_v21 = vld [vmem:[#allocation2 + $0x354] ss:$8 sps:$4 sm:$0xff]   ;;  %v1683_v23 = vld [vmem:[#allocation2 + $0x350] ss:$8 sps:$4 sm:$0xff]   ;;  %v1691_v25 = vld [vmem:[#allocation2 + $0x344] ss:$8 sps:$4 sm:$0xff]  }
  0x2a   :  { %v1686_v26 = vld [vmem:[#allocation2 + $0x240] ss:$8 sps:$4 sm:$0xff]   ;;  %v1694_v28 = vld [vmem:[#allocation2 + $0x234] ss:$8 sps:$4 sm:$0xff]   ;;  %v1719_v53 = vld [vmem:[#allocation2 + $0x3f0] ss:$8 sps:$4 sm:$0xff]  }
  0x2b   :  { %862 = vmatpush1.bf16.msra.mxu0 %v1618_v30  ;;  %v1689_v27 = vld [vmem:[#allocation2 + $0x340] ss:$8 sps:$4 sm:$0xff]   ;;  %v1697_v29 = vld [vmem:[#allocation2 + $0x334] ss:$8 sps:$4 sm:$0xff]   ;;  %v1692_v30 = vld [vmem:[#allocation2 + $0x230] ss:$8 sps:$4 sm:$0xff]  }
  0x2c   :  { %905 = vmatpush1.bf16.msra.mxu1 %v1619_v31  ;;  %863 = vmatprep.subr.bf16.mxu0 %v1620_v32  ;;  %v1695_v31 = vld [vmem:[#allocation2 + $0x330] ss:$8 sps:$4 sm:$0xff]   ;;  %v1700_v32 = vld [vmem:[#allocation2 + $0x224] ss:$8 sps:$4 sm:$0xff]   ;;  %v1710_v47 = vld [vmem:[#allocation2 + $0x200] ss:$8 sps:$4 sm:$0xff]  }
  0x2d   :  { %906 = vmatprep.subr.bf16.mxu1 %v1622_v33  ;;  %v1703_v33 = vld [vmem:[#allocation2 + $0x324] ss:$8 sps:$4 sm:$0xff]   ;;  %v58_v46 = vld [vmem:[%s2007_s0 + $0x78] sm:$0xff]  ;;  %v1713_v48 = vld [vmem:[#allocation2 + $0x300] ss:$8 sps:$4 sm:$0xff]  }
  0x2e   :  { %v1724_v54 = vld [vmem:[#allocation2 + $0x2e4] ss:$8 sps:$4 sm:$0xff]   ;;  %v1746_v8 = vld [vmem:[#allocation2 + $0x2a0] ss:$8 sps:$4 sm:$0xff]  }
  0x2f   :  { %864 = vmatpush2.bf16.msra.mxu0 %v1624_v34  ;;  %v1698_v34 = vld [vmem:[#allocation2 + $0x220] ss:$8 sps:$4 sm:$0xff]   ;;  %v1748_v6 = vld [vmem:[#allocation2 + $0x2a4] ss:$8 sps:$4 sm:$0xff]  }
  0x30   :  { %907 = vmatpush2.bf16.msra.mxu1 %v1625_v35  ;;  %865 = vmatprep.subr.bf16.mxu0 %v1626_v36  ;;  %v1701_v35 = vld [vmem:[#allocation2 + $0x320] ss:$8 sps:$4 sm:$0xff]   ;;  %v1706_v36 = vld [vmem:[#allocation2 + $0x214] ss:$8 sps:$4 sm:$0xff]   ;;  %v1751_v7 = vld [vmem:[#allocation2 + $0x3a4] ss:$8 sps:$4 sm:$0xff]  }
  0x31   :  { %908 = vmatprep.subr.bf16.mxu1 %v1628_v37  ;;  %v1709_v37 = vld [vmem:[#allocation2 + $0x314] ss:$8 sps:$4 sm:$0xff]   ;;  %v1749_v9 = vld [vmem:[#allocation2 + $0x3a0] ss:$8 sps:$4 sm:$0xff]  }
  0x33   :  { %866 = vmatpush2.bf16.msra.mxu0 %v1630_v38  ;;  %v1704_v38 = vld [vmem:[#allocation2 + $0x210] ss:$8 sps:$4 sm:$0xff]  }
  0x34   :  { %909 = vmatpush2.bf16.msra.mxu1 %v1631_v39  ;;  %867 = vmatprep.subr.bf16.mxu0 %v1632_v40  ;;  %v1707_v39 = vld [vmem:[#allocation2 + $0x310] ss:$8 sps:$4 sm:$0xff]   ;;  %v48_v40 = vld [vmem:[%s2007_s0 + $0x28] sm:$0xff] }
  0x35   :  { %910 = vmatprep.subr.bf16.mxu1 %v1634_v41  ;;  %v56_v41 = vld [vmem:[%s2007_s0 + $0x68] sm:$0xff] }
  0x37   :  { %868 = vmatpush2.bf16.msra.mxu0 %v1636_v42  ;;  %v50_v42 = vld [vmem:[%s2007_s0 + $0x38] sm:$0xff] }
  0x38   :  { %911 = vmatpush2.bf16.msra.mxu1 %v1637_v43  ;;  %869 = vmatprep.subr.bf16.mxu0 %v1638_v44  ;;  %v1712_v43 = vld [vmem:[#allocation2 + $0x204] ss:$8 sps:$4 sm:$0xff]   ;;  %v66_v49 = vpack.c.bf16 %v58_v46, %v50_v42  ;;  %v1781_v42 = vld [vmem:[%s2012_s5 + $0x30] sm:$0xff]  }
  0x39   :  { %912 = vmatprep.subr.bf16.mxu1 %v1640_v45  ;;  %v1715_v44 = vld [vmem:[#allocation2 + $0x304] ss:$8 sps:$4 sm:$0xff]   ;;  %v64_v45 = vpack.c.bf16 %v56_v41, %v48_v40  ;;  %v1780_v40 = vld [vmem:[%s2012_s5 + $0x38] sm:$0xff]   ;;  %v1813_v41 = vmov 0.0  }
  0x3b   :  { %870 = vmatpush2.bf16.msra.mxu0 %v1642_v50  ;;  %v1718_v50 = vld [vmem:[#allocation2 + $0x2f4] ss:$8 sps:$4 sm:$0xff]  }
  0x3c   :  { %913 = vmatpush2.bf16.msra.mxu1 %v1643_v51  ;;  %871 = vmatprep.subr.bf16.mxu0 %v1644_v52  ;;  %v1721_v51 = vld [vmem:[#allocation2 + $0x3f4] ss:$8 sps:$4 sm:$0xff]   ;;  %v1716_v52 = vld [vmem:[#allocation2 + $0x2f0] ss:$8 sps:$4 sm:$0xff]  }
  0x3d   :  { %914 = vmatprep.subr.bf16.mxu1 %v1646_v55  ;;  %v1727_v55 = vld [vmem:[#allocation2 + $0x3e4] ss:$8 sps:$4 sm:$0xff]  }
  0x3f   :  { %872 = vmatpush2.bf16.msra.mxu0 %v1648_v56  ;;  %v1722_v56 = vld [vmem:[#allocation2 + $0x2e0] ss:$8 sps:$4 sm:$0xff]  }
  0x40   :  { %915 = vmatpush2.bf16.msra.mxu1 %v1649_v57  ;;  %873 = vmatprep.subr.bf16.mxu0 %v1650_v58  ;;  %v1725_v57 = vld [vmem:[#allocation2 + $0x3e0] ss:$8 sps:$4 sm:$0xff]   ;;  %v1730_v58 = vld [vmem:[#allocation2 + $0x2d4] ss:$8 sps:$4 sm:$0xff]  }
  0x41   :  { %916 = vmatprep.subr.bf16.mxu1 %v1652_v59  ;;  %v1733_v59 = vld [vmem:[#allocation2 + $0x3d4] ss:$8 sps:$4 sm:$0xff]  }
  0x43   :  { %874 = vmatpush2.bf16.msra.mxu0 %v1654_v60  ;;  %v1728_v60 = vld [vmem:[#allocation2 + $0x2d0] ss:$8 sps:$4 sm:$0xff]  }
  0x44   :  { %917 = vmatpush2.bf16.msra.mxu1 %v1655_v61  ;;  %875 = vmatprep.subr.bf16.mxu0 %v1656_v62  ;;  %v1731_v61 = vld [vmem:[#allocation2 + $0x3d0] ss:$8 sps:$4 sm:$0xff]   ;;  %v1736_v62 = vld [vmem:[#allocation2 + $0x2c4] ss:$8 sps:$4 sm:$0xff]  }
  0x45   :  { %918 = vmatprep.subr.bf16.mxu1 %v1658_v63  ;;  %v1739_v63 = vld [vmem:[#allocation2 + $0x3c4] ss:$8 sps:$4 sm:$0xff]  }
  0x47   :  { %876 = vmatpush2.bf16.msra.mxu0 %v1660_v0  ;;  %v1734_v0 = vld [vmem:[#allocation2 + $0x2c0] ss:$8 sps:$4 sm:$0xff]  }
  0x48   :  { %919 = vmatpush2.bf16.msra.mxu1 %v1661_v1  ;;  %877 = vmatprep.subr.bf16.mxu0 %v1662_v2  ;;  %v1737_v1 = vld [vmem:[#allocation2 + $0x3c0] ss:$8 sps:$4 sm:$0xff]   ;;  %v1742_v2 = vld [vmem:[#allocation2 + $0x2b4] ss:$8 sps:$4 sm:$0xff]  }
  0x49   :  { %920 = vmatprep.subr.bf16.mxu1 %v1664_v3  ;;  %v1745_v3 = vld [vmem:[#allocation2 + $0x3b4] ss:$8 sps:$4 sm:$0xff]  }
  0x4b   :  { %878 = vmatpush2.bf16.msra.mxu0 %v1666_v4  ;;  %v1740_v4 = vld [vmem:[#allocation2 + $0x2b0] ss:$8 sps:$4 sm:$0xff]  }
  0x4c   :  { %921 = vmatpush2.bf16.msra.mxu1 %v1667_v5  ;;  %933 = vmatprep.subr.bf16.mxu0 %v1670_v10  ;;  %v1743_v5 = vld [vmem:[#allocation2 + $0x3b0] ss:$8 sps:$4 sm:$0xff]   ;;  %v1754_v10 = vld [vmem:[#allocation2 + $0x294] ss:$8 sps:$4 sm:$0xff]  }
  0x4d   :  { %976 = vmatprep.subr.bf16.mxu1 %v1673_v11  ;;  %v1757_v11 = vld [vmem:[#allocation2 + $0x394] ss:$8 sps:$4 sm:$0xff]  }
  0x4e   :  { %880 = vmatmul.mubr.bf16.vlgmr.msra.gmra.mxu0 %v59_v12  ;;  %v1752_v12 = vld [vmem:[#allocation2 + $0x290] ss:$8 sps:$4 sm:$0xff]  }
  0x4f   :  { %923 = vmatmul.mubr.bf16.vlgmr.msra.gmra.mxu1 %v61_v13  ;;  %934 = vmatpush1.bf16.msra.mxu0 %v1668_v14  ;;  %v1755_v13 = vld [vmem:[#allocation2 + $0x390] ss:$8 sps:$4 sm:$0xff]   ;;  %v1760_v14 = vld [vmem:[#allocation2 + $0x284] ss:$8 sps:$4 sm:$0xff]  }
  0x50   :  { %977 = vmatpush1.bf16.msra.mxu1 %v1671_v15  ;;  %935 = vmatprep.subr.bf16.mxu0 %v1676_v16  ;;  %v1763_v15 = vld [vmem:[#allocation2 + $0x384] ss:$8 sps:$4 sm:$0xff]   ;;  %v1758_v16 = vld [vmem:[#allocation2 + $0x280] ss:$8 sps:$4 sm:$0xff]  }
  0x51   :  { %978 = vmatprep.subr.bf16.mxu1 %v1679_v17  ;;  %965 = vmatprep.mubr.bf16.mxu0 %v64_v45  ;;  %v1761_v17 = vld [vmem:[#allocation2 + $0x380] ss:$8 sps:$4 sm:$0xff]   ;;  %v197_v45 = vlaneseq }
  0x52   :  { %1008 = vmatprep.mubr.bf16.mxu1 %v66_v49 }
  0x53   :  { %936 = vmatpush1.bf16.msra.mxu0 %v1674_v18  ;;  %v47_v18 = vld [vmem:[%s2007_s0 + $0x20] sm:$0xff]  ;;  %v198_v46 = vshrl.u32 %v197_v45, 7 }
  0x54   :  { %979 = vmatpush1.bf16.msra.mxu1 %v1677_v19  ;;  %937 = vmatprep.subr.bf16.mxu0 %v1682_v20  ;;  %v55_v19 = vld [vmem:[%s2007_s0 + $0x60] sm:$0xff]  ;;  %v49_v20 = vld [vmem:[%s2007_s0 + $0x30] sm:$0xff] }
  0x55   :  { %980 = vmatprep.subr.bf16.mxu1 %v1685_v21  ;;  %v57_v21 = vld [vmem:[%s2007_s0 + $0x70] sm:$0xff]  ;;  %v203_v49 = vsub.s32 1, %v198_v46 }
  0x57   :  { %938 = vmatpush1.bf16.msra.mxu0 %v1680_v22  ;;  %v63_v22 = vpack.c.bf16 %v55_v19, %v47_v18 }
  0x58   :  { %981 = vmatpush1.bf16.msra.mxu1 %v1683_v23  ;;  %939 = vmatprep.subr.bf16.mxu0 %v1688_v24  ;;  %v65_v23 = vpack.c.bf16 %v57_v21, %v49_v20  ;;  %v1764_v24 = vld [vmem:[%s2010_s3 + $0x78] sm:$0xff]  }
  0x59   :  { %982 = vmatprep.subr.bf16.mxu1 %v1691_v25  ;;  %v1765_v25 = vld [vmem:[%s2010_s3 + $0x38] sm:$0xff]  }
  0x5b   :  { %940 = vmatpush1.bf16.msra.mxu0 %v1686_v26  ;;  %v1766_v26 = vld [vmem:[%s2010_s3 + $0x70] sm:$0xff]  }
  0x5c   :  { %983 = vmatpush1.bf16.msra.mxu1 %v1689_v27  ;;  %941 = vmatprep.subr.bf16.mxu0 %v1694_v28  ;;  %v1767_v27 = vld [vmem:[%s2010_s3 + $0x30] sm:$0xff]   ;;  %v1768_v28 = vld [vmem:[%s2010_s3 + $0x68] sm:$0xff]  }
  0x5d   :  { %984 = vmatprep.subr.bf16.mxu1 %v1697_v29  ;;  %v1769_v29 = vld [vmem:[%s2010_s3 + $0x28] sm:$0xff]  }
  0x5f   :  { %942 = vmatpush1.bf16.msra.mxu0 %v1692_v30  ;;  %v1770_v30 = vld [vmem:[%s2010_s3 + $0x60] sm:$0xff]  }
  0x60   :  { %985 = vmatpush1.bf16.msra.mxu1 %v1695_v31  ;;  %943 = vmatprep.subr.bf16.mxu0 %v1700_v32  ;;  %v1771_v31 = vld [vmem:[%s2010_s3 + $0x20] sm:$0xff]   ;;  %v1772_v32 = vld [vmem:[%s2010_s3 + $0x58] sm:$0xff]  }
  0x61   :  { %986 = vmatprep.subr.bf16.mxu1 %v1703_v33  ;;  %v1773_v33 = vld [vmem:[%s2010_s3 + $0x18] sm:$0xff]  }
  0x63   :  { %944 = vmatpush1.bf16.msra.mxu0 %v1698_v34  ;;  %v1774_v34 = vld [vmem:[%s2010_s3 + $0x50] sm:$0xff]  }
  0x64   :  { %987 = vmatpush1.bf16.msra.mxu1 %v1701_v35  ;;  %945 = vmatprep.subr.bf16.mxu0 %v1706_v36  ;;  %v1775_v35 = vld [vmem:[%s2010_s3 + $0x10] sm:$0xff]   ;;  %v1776_v36 = vld [vmem:[%s2010_s3 + $0x48] sm:$0xff]  }
  0x65   :  { %988 = vmatprep.subr.bf16.mxu1 %v1709_v37  ;;  %v1777_v37 = vld [vmem:[%s2010_s3 + $0x8] sm:$0xff]  }
  0x67   :  { %946 = vmatpush1.bf16.msra.mxu0 %v1704_v38  ;;  %v1778_v38 = vld [vmem:[%s2010_s3 + $0x40] sm:$0xff]  }
  0x68   :  { %989 = vmatpush1.bf16.msra.mxu1 %v1707_v39  ;;  %947 = vmatprep.subr.bf16.mxu0 %v1712_v43  ;;  %v1779_v39 = vld [vmem:[%s2010_s3] sm:$0xff]   ;;  %v1782_v43 = vld [vmem:[%s2012_s5 + $0x28] sm:$0xff]  }
  0x69   :  { %990 = vmatprep.subr.bf16.mxu1 %v1715_v44  ;;  %v1783_v44 = vld [vmem:[%s2012_s5 + $0x20] sm:$0xff]  }
  0x6b   :  { %948 = vmatpush1.bf16.msra.mxu0 %v1710_v47 }
  0x6c   :  { %991 = vmatpush1.bf16.msra.mxu1 %v1713_v48  ;;  %949 = vmatprep.subr.bf16.mxu0 %v1718_v50  ;;  %v195_v50 = vld [vmem:[%s2009_s2] sm:$0x3] }
  0x6d   :  { %992 = vmatprep.subr.bf16.mxu1 %v1721_v51  ;;  %v199_v51 = vsub.s32 0, %v198_v46 }
  0x6f   :  { %950 = vmatpush2.bf16.msra.mxu0 %v1716_v52 }
  0x70   :  { %993 = vmatpush2.bf16.msra.mxu1 %v1719_v53  ;;  %951 = vmatprep.subr.bf16.mxu0 %v1724_v54  ;;  %v204_v54 = vrot.slane %v195_v50, %v203_v49 }
  0x71   :  { %994 = vmatprep.subr.bf16.mxu1 %v1727_v55  ;;  %v200_v55 = vrot.slane %v195_v50, %v199_v51 }
  0x73   :  { %952 = vmatpush2.bf16.msra.mxu0 %v1722_v56 }
  0x74   :  { %995 = vmatpush2.bf16.msra.mxu1 %v1725_v57  ;;  %953 = vmatprep.subr.bf16.mxu0 %v1730_v58 }
  0x75   :  { %996 = vmatprep.subr.bf16.mxu1 %v1733_v59 }
  0x77   :  { %954 = vmatpush2.bf16.msra.mxu0 %v1728_v60 }
  0x78   :  { %997 = vmatpush2.bf16.msra.mxu1 %v1731_v61  ;;  %955 = vmatprep.subr.bf16.mxu0 %v1736_v62 }
  0x79   :  { %998 = vmatprep.subr.bf16.mxu1 %v1739_v63 }
  0x7b   :  { %956 = vmatpush2.bf16.msra.mxu0 %v1734_v0 }
  0x7c   :  { %999 = vmatpush2.bf16.msra.mxu1 %v1737_v1  ;;  %957 = vmatprep.subr.bf16.mxu0 %v1742_v2 }
  0x7d   :  { %1000 = vmatprep.subr.bf16.mxu1 %v1745_v3 }
  0x7f   :  { %958 = vmatpush2.bf16.msra.mxu0 %v1740_v4 }
  0x80   :  { %1001 = vmatpush2.bf16.msra.mxu1 %v1743_v5  ;;  %959 = vmatprep.subr.bf16.mxu0 %v1748_v6 }
  0x81   :  { %1002 = vmatprep.subr.bf16.mxu1 %v1751_v7 }
  0x83   :  { %960 = vmatpush2.bf16.msra.mxu0 %v1746_v8 }
  0x84   :  { %1003 = vmatpush2.bf16.msra.mxu1 %v1749_v9  ;;  %961 = vmatprep.subr.bf16.mxu0 %v1754_v10 }
  0x85   :  { %1004 = vmatprep.subr.bf16.mxu1 %v1757_v11 }
  0x87   :  { %962 = vmatpush2.bf16.msra.mxu0 %v1752_v12 }
  0x88   :  { %1005 = vmatpush2.bf16.msra.mxu1 %v1755_v13  ;;  %963 = vmatprep.subr.bf16.mxu0 %v1760_v14 }
  0x89   :  { %1006 = vmatprep.subr.bf16.mxu1 %v1763_v15 }
  0x8b   :  { %964 = vmatpush2.bf16.msra.mxu0 %v1758_v16 }
  0x8c   :  { %1007 = vmatpush2.bf16.msra.mxu1 %v1761_v17  ;;  %1516 = vmatprep.subr.bf16.mxu0 %v1764_v24 }
  0x8d   :  { %1547 = vmatprep.subr.bf16.mxu1 %v1813_v41 }
  0x8e   :  { %966 = vmatmul.mubr.bf16.vlgmr.msra.gmra.mxu0 %v63_v22 }
  0x8f   :  { %1009 = vmatmul.mubr.bf16.vlgmr.msra.gmra.mxu1 %v65_v23  ;;  %1517 = vmatpush3.bf16.msra.mxu0 %v1765_v25 }
  0x90   :  { %1518 = vmatprep.subr.bf16.mxu0 %v1766_v26  ;;  %1548 = vmatpush3.bf16.msra.mxu1 %v1780_v40  ;;  %v1784_v26 = vld [vmem:[%s2012_s5 + $0x18] sm:$0xff]  }
  0x91   :  { %1549 = vmatprep.subr.bf16.mxu1 %v1813_v41  ;;  %1563 = vmatprep.mubr.msk.bf16.mxu1 %vm1814_vm0, %v1813_v41 }
  0x93   :  { %1519 = vmatpush3.bf16.msra.mxu0 %v1767_v27  ;;  %v1785_v27 = vld [vmem:[%s2012_s5 + $0x10] sm:$0xff]  }
  0x94   :  { %1520 = vmatprep.subr.bf16.mxu0 %v1768_v28  ;;  %1550 = vmatpush3.bf16.msra.mxu1 %v1781_v42  ;;  %v1786_v28 = vld [vmem:[%s2012_s5 + $0x8] sm:$0xff]  }
  0x95   :  { %1551 = vmatprep.subr.bf16.mxu1 %v1813_v41 }
  0x97   :  { %1521 = vmatpush3.bf16.msra.mxu0 %v1769_v29  ;;  %v1787_v29 = vld [vmem:[%s2012_s5] sm:$0xff]  }
  0x98   :  { %1522 = vmatprep.subr.bf16.mxu0 %v1770_v30  ;;  %1552 = vmatpush3.bf16.msra.mxu1 %v1782_v43  ;;  %v1489_v43 = vld [vmem:[%s2013_s6] ss:$0 sm:$0xff] }
  0x99   :  { %1553 = vmatprep.subr.bf16.mxu1 %v1813_v41 }
  0x9b   :  { %1523 = vmatpush3.bf16.msra.mxu0 %v1771_v31 }
  0x9c   :  { %1524 = vmatprep.subr.bf16.mxu0 %v1772_v32  ;;  %1554 = vmatpush3.bf16.msra.mxu1 %v1783_v44 }
  0x9d   :  { %1555 = vmatprep.subr.bf16.mxu1 %v1813_v41 }
  0x9f   :  { %1525 = vmatpush3.bf16.msra.mxu0 %v1773_v33  ;;  %v1472_v33 = vld [vmem:[%s2011_s4] ss:$0 sm:$0xff] }
  0xa0   :  { %1526 = vmatprep.subr.bf16.mxu0 %v1774_v34  ;;  %1556 = vmatpush3.bf16.msra.mxu1 %v1784_v26 }
  0xa1   :  { %1557 = vmatprep.subr.bf16.mxu1 %v1813_v41 }
  0xa3   :  { %1527 = vmatpush3.bf16.msra.mxu0 %v1775_v35 }
  0xa4   :  { %1528 = vmatprep.subr.bf16.mxu0 %v1776_v36  ;;  %1558 = vmatpush3.bf16.msra.mxu1 %v1785_v27 }
  0xa5   :  { %1559 = vmatprep.subr.bf16.mxu1 %v1813_v41 }
  0xa7   :  { %1529 = vmatpush3.bf16.msra.mxu0 %v1777_v37 }
  0xa8   :  { %1530 = vmatprep.subr.bf16.mxu0 %v1778_v38  ;;  %1560 = vmatpush3.bf16.msra.mxu1 %v1786_v28 }
  0xa9   :  { %1561 = vmatprep.subr.bf16.mxu1 %v1813_v41 }
  0xab   :  { %1531 = vmatpush3.bf16.msra.mxu0 %v1779_v39 }
  0xac   :  { %1562 = vmatpush3.bf16.msra.mxu1 %v1787_v29 }
 0x10e   :  { %v881_v47 = vpop.f32.mrf.mxu0 }
 0x10f   :  { %v924_v48 = vpop.f32.mrf.mxu1  ;;  %v882_v59 = vadd.f32 %v881_v47, %v200_v55 }
 0x110   :  { %v883_v52 = vpop.f32.mrf.mxu0 }
 0x111   :  { %v926_v53 = vpop.f32.mrf.mxu1  ;;  %v884_v58 = vadd.f32 %v883_v52, %v204_v54  ;;  %v925_v3 = vadd.f32 %v924_v48, %v882_v59 }
 0x112   :  { %v885_v56 = vpop.f32.mrf.mxu0 }
 0x113   :  { %v928_v57 = vpop.f32.mrf.mxu1  ;;  %v886_v62 = vadd.f32 %v885_v56, %v200_v55  ;;  %v927_v1 = vadd.f32 %v926_v53, %v884_v58 }
 0x114   :  { %v887_v60 = vpop.f32.mrf.mxu0 }
 0x115   :  { %v930_v61 = vpop.f32.mrf.mxu1  ;;  %v888_v2 = vadd.f32 %v887_v60, %v204_v54  ;;  %v929_v6 = vadd.f32 %v928_v57, %v886_v62 }
 0x117   :  { %v931_v11 = vadd.f32 %v930_v61, %v888_v2 }
 0x14e   :  { %v967_v63 = vpop.f32.mrf.mxu0 }
 0x14f   :  { %v1010_v0 = vpop.f32.mrf.mxu1  ;;  %v968_v8 = vadd.f32 %v967_v63, %v925_v3 }
 0x150   :  { %v969_v4 = vpop.f32.mrf.mxu0 }
 0x151   :  { %v1012_v5 = vpop.f32.mrf.mxu1  ;;  %v970_v7 = vadd.f32 %v969_v4, %v927_v1  ;;  %v1011_v17 = vadd.f32 %v1010_v0, %v968_v8 }
 0x152   :  { %v971_v9 = vpop.f32.mrf.mxu0 }
 0x153   :  { %v1014_v10 = vpop.f32.mrf.mxu1  ;;  %v972_v12 = vadd.f32 %v971_v9, %v929_v6  ;;  %v1013_v14 = vadd.f32 %v1012_v5, %v970_v7  ;;  %v1019_v23 = vmax.f32 %v1011_v17, 0.0 }
 0x154   :  { %v973_v13 = vpop.f32.mrf.mxu0 }
 0x155   :  { %v1015_v15 = vadd.f32 %v1014_v10, %v972_v12  ;;  %v974_v16 = vadd.f32 %v973_v13, %v931_v11  ;;  %v1016_v18 = vpop.f32.mrf.mxu1  ;;  %v1020_v21 = vmax.f32 %v1013_v14, 0.0 }
 0x157   :  { %v1017_v19 = vadd.f32 %v1016_v18, %v974_v16  ;;  %v1021_v20 = vmax.f32 %v1015_v15, 0.0 }
 0x159   :  { %v1022_v22 = vmax.f32 %v1017_v19, 0.0  ;;  %v1023_v25 = vpack.c.bf16 %v1021_v20, %v1019_v23 }
 0x15b   :  { %v1024_v24 = vpack.c.bf16 %v1022_v22, %v1020_v21 }
 0x15d   :  { %1192 = vmatprep.mubr.bf16.mxu0 %v1024_v24 }
 0x15e   :  { %1193 = vmatmul.mubr.bf16.vlgmr.msra.gmra.mxu0 %v1023_v25 }
 0x21e   :  { %v1532_v30 = vpop.f32.mrf.mxu0 }
 0x220   :  { %v1533_v31 = vpop.f32.mrf.mxu0 }
 0x221   :  { %v1534_v32 = vadd.f32 %v1533_v31, %v1532_v30 }
 0x222   :  { %v1535_v34 = vpop.f32.mrf.mxu0 }
 0x223   :  { %v1195_v36 = vadd.f32 %v1534_v32, %v1472_v33 }
 0x224   :  { %v1536_v35 = vpop.f32.mrf.mxu0 }
 0x225   :  { %v1537_v37 = vadd.f32 %v1536_v35, %v1535_v34  ;;  %v1201_v39 = vmax.f32 %v1195_v36, 0.0 }
 0x227   :  { %v1198_v38 = vadd.f32 %v1537_v37, %v1472_v33 }
 0x229   :  { %v1202_v40 = vmax.f32 %v1198_v38, 0.0 }
 0x22b   :  { %v1203_v42 = vpack.c.bf16 %v1202_v40, %v1201_v39 }
 0x22d   :  { %1510 = vst [vmem:[%s2015_s8] sm:$0xff] %v1203_v42   ;;  %1564 = vmatmul.mubr.bf16.vlgmr.msra.gmra.mxu1 %v1203_v42 }
 0x2ed   :  { %v1309_v41 = vpop.f32.mrf.mxu1 }
 0x2ee   :  { %v1310_v46 = vadd.f32 %v1489_v43, %v1309_v41 }
 0x2ef   :  { %v1565_v44 = vpop.f32.mrf.mxu1 }
 0x2f1   :  { %v1312_v45 = vpop.f32.mrf.mxu1 }
 0x2f2   :  { %v1313_v47 = vadd.f32 %v1489_v43, %v1312_v45 }
 0x2f3   :  { %v1566_v48 = vpop.f32.mrf.mxu1 }
 0x2f4   :  { %v1514_v49 = vpack.c.bf16 %v1313_v47, %v1310_v46 }
 0x2f6   :  { %1515 = vst [vmem:[%s2014_s7] sm:$0xff] %v1514_v49  }
 0x2f7   :  { %1343 = vsyncpa [#allocation3], 1 }

</bundles_post_ra>
